<compile_context>
chip_gen: v5e
topology: v5e:2x2
jax: 0.10.0
libtpu: 0.0.40
codegen_flags: <defaults>
</compile_context>

<pallas_src>
import functools

import jax
import jax.numpy as jnp
from jax.experimental import pallas as pl
from jax.experimental.pallas import tpu as pltpu


def _round_up(x, m):
    return (x + m - 1) // m * m


def _feature_embedding_kernel(xc_ref, xn_ref, w_ref, m_ref, g_ref, b_ref,
                              out_ref, *, eps, ncls, d_cls, n_num,
                              use_mxu_gather):
    # xc_ref:  (TN, d_cls)              int32
    # xn_ref:  (TN, n_num)              float32
    # w_ref:   (d_cls*ncls + n_num, W)  float32   block-diagonal fused weights
    # m_ref:   (W, W)                   float32   block-diag ones(dim,dim)/dim
    # g_ref:   (1, W)                   float32   LN weight tiled per feature
    # b_ref:   (1, W)                   float32   LN bias tiled per feature
    # out_ref: (TN, W)                  out_dtype (W = (d_cls + n_num) * dim)
    tn = xc_ref.shape[0]
    width = out_ref.shape[1]
    k_cat = d_cls * ncls

    # Hoisted grid-invariant loads.
    w = w_ref[...]
    gamma = g_ref[...]
    beta = b_ref[...]

    if use_mxu_gather:
        # One fused MXU gather: [one-hot(all cat feats) | xn] @ W -> lane-dense
        # slab, filling the MXU N dimension instead of F separate 32-lane dots.
        iota = jax.lax.broadcasted_iota(jnp.int32, (tn, ncls), 1)
        parts = [(xc_ref[:, f:f + 1] == iota).astype(jnp.float32)
                 for f in range(d_cls)]
        parts.append(xn_ref[...])
        inp = parts[0] if len(parts) == 1 else jnp.concatenate(parts, axis=1)
        slab = jnp.dot(inp, w, preferred_element_type=jnp.float32)
    else:
        # Tiny fan-in: full-width VPU select / broadcast-multiply accumulation
        # (exact, avoids a <1%-utilized MXU and any one-hot intermediate).
        slab = jnp.zeros((tn, width), jnp.float32)
        for f in range(d_cls):                      # static, small loops
            idx = xc_ref[:, f:f + 1]                # (TN, 1) int32
            for c in range(ncls):
                sel = (idx == c).astype(jnp.float32)            # (TN, 1)
                slab = slab + sel * w[f * ncls + c:f * ncls + c + 1, :]
        for j in range(n_num):
            slab = slab + xn_ref[:, j:j + 1] * w[k_cat + j:k_cat + j + 1, :]

    # Segmented BertLayerNorm: per-feature mean/var over each dim-lane group
    # via block-averaging matmuls (all 128 lanes busy, no per-feature partial
    # reductions / masked stores).
    mean_b = jnp.dot(slab, m_ref[...], preferred_element_type=jnp.float32)
    diff = slab - mean_b
    var_b = jnp.dot(diff * diff, m_ref[...], preferred_element_type=jnp.float32)
    inv = jax.lax.rsqrt(var_b + eps)                             # EUP
    y = diff * inv * gamma + beta
    out_ref[...] = y.astype(out_ref.dtype)      # single full-width store


def feature_embedding(xc, xn, cls_tables, num_w, ln_w, ln_b, *,
                      eps=1e-12, max_token_tile=1024, out_dtype=jnp.float32):
    """xc: (b, s, d_cls) int; xn: (b, s, n_num) float.
    Returns (b, s, d_cls + n_num, dim) in `out_dtype`."""
    b, s, d_cls = xc.shape
    n_num = xn.shape[-1]
    dim = num_w.shape[-1]
    ncls = cls_tables.shape[1]
    f_total = d_cls + n_num
    width = f_total * dim
    n_tok = b * s
    k_cat = d_cls * ncls
    k_total = k_cat + n_num

    # ---- static parameter packing (fused block-diagonal weights, LN consts) ----
    cls_tables = cls_tables.astype(jnp.float32)
    num_w = num_w.astype(jnp.float32)
    w = jnp.zeros((k_total, width), jnp.float32)
    for f in range(d_cls):
        w = w.at[f * ncls:(f + 1) * ncls, f * dim:(f + 1) * dim].set(cls_tables[f])
    for j in range(n_num):
        w = w.at[k_cat + j, (d_cls + j) * dim:(d_cls + j + 1) * dim].set(num_w[j])
    # Per-feature block-averaging matrix: block-diag of ones(dim, dim)/dim.
    m = jnp.kron(jnp.eye(f_total, dtype=jnp.float32),
                 jnp.ones((dim, dim), jnp.float32) / dim)
    gamma_t = jnp.tile(ln_w.astype(jnp.float32), f_total).reshape(1, width)
    beta_t = jnp.tile(ln_b.astype(jnp.float32), f_total).reshape(1, width)

    xc_flat = xc.reshape(n_tok, d_cls).astype(jnp.int32)
    xn_flat = xn.reshape(n_tok, n_num).astype(jnp.float32)

    # ---- VMEM-budgeted token tile (no host padding; Pallas masks the partial
    #      last block). ----
    out_itemsize = jnp.dtype(out_dtype).itemsize
    align = max(8, 32 // out_itemsize)          # 8 for f32, 16 for bf16
    per_tok = (2 * (d_cls + n_num) * 4          # double-buffered inputs
               + 2 * width * out_itemsize       # double-buffered output block
               + 6 * width * 4)                 # slab / LN temporaries (f32)
    budget = 24 << 20                           # safe vs v7x's 32 MiB scoped default
    cap = max(align, (budget // per_tok) // align * align)
    token_tile = min(max_token_tile, cap, _round_up(n_tok, align))
    token_tile = max(align, token_tile // align * align)
    # Keep >=2 grid steps when possible so both v7x TensorCores get work.
    if n_tok > align and pl.cdiv(n_tok, token_tile) < 2:
        token_tile = max(align, _round_up(pl.cdiv(n_tok, 2), align))

    param_bytes = 2 * 4 * (k_total * width + width * width + 2 * width)
    est_vmem = param_bytes + token_tile * per_tok
    vmem_limit = int(min(max(2 * est_vmem, 16 << 20), 48 << 20))

    use_mxu_gather = k_total > 32
    grid = (pl.cdiv(n_tok, token_tile),)

    out = pl.pallas_call(
        functools.partial(_feature_embedding_kernel, eps=eps, ncls=ncls,
                          d_cls=d_cls, n_num=n_num,
                          use_mxu_gather=use_mxu_gather),
        out_shape=jax.ShapeDtypeStruct((n_tok, width), out_dtype),
        grid_spec=pltpu.PrefetchScalarGridSpec(
            num_scalar_prefetch=0,
            grid=grid,
            in_specs=[
                pl.BlockSpec((token_tile, d_cls), lambda i: (i, 0)),
                pl.BlockSpec((token_tile, n_num), lambda i: (i, 0)),
                pl.BlockSpec((k_total, width), lambda i: (0, 0)),
                pl.BlockSpec((width, width), lambda i: (0, 0)),
                pl.BlockSpec((1, width), lambda i: (0, 0)),
                pl.BlockSpec((1, width), lambda i: (0, 0)),
            ],
            # Lane-dense output block; one unmasked full-width store per tile.
            out_specs=pl.BlockSpec((token_tile, width), lambda i: (i, 0)),
        ),
        compiler_params=pltpu.CompilerParams(
            dimension_semantics=("parallel",),
            vmem_limit_bytes=vmem_limit),
    )(xc_flat, xn_flat, w, m, gamma_t, beta_t)

    # (n_tok, F*dim) -> (b, s, F, dim): pure split-reshape, no extra HBM copy.
    return out.reshape(b, s, f_total, dim)


def _reference(xc, xn, cls_tables, num_w, ln_w, ln_b, eps=1e-12):
    """Pure-JAX reference mirroring the PyTorch forward (eval mode)."""
    b, s, d_cls = xc.shape
    embs = []
    for i in range(d_cls):
        embs.append(jnp.take(cls_tables[i], xc[:, :, i], axis=0)[:, :, None, :])
    xc_emb = jnp.concatenate(embs, axis=2)                     # (b, s, d_cls, dim)
    xn_emb = xn[..., None] * num_w                             # (b, s, n_num, dim)
    xnc = jnp.concatenate([xc_emb, xn_emb], axis=2)
    u = jnp.mean(xnc, axis=-1, keepdims=True)
    var = jnp.mean((xnc - u) ** 2, axis=-1, keepdims=True)
    xh = (xnc - u) / jnp.sqrt(var + eps)
    return ln_w * xh + ln_b


if __name__ == "__main__":
    key = jax.random.PRNGKey(0)
    k1, k2, k3, k4 = jax.random.split(key, 4)

    # Small shapes consistent with the module defaults:
    #   cls_feats=[2]  -> d_cls=1 categorical feature with vocab 2
    #   n_num_feats=3  -> 3 numerical features
    #   dim=32, batch=2, seq=8
    b, s, dim = 2, 8, 32
    cls_feats = [2]
    d_cls = len(cls_feats)
    ncls = max(cls_feats)
    n_num = 3

    # Deterministic parameter init (nn.Embedding ~ N(0,1), LayerNorm ones/zeros).
    cls_tables = jax.random.normal(k1, (d_cls, ncls, dim), jnp.float32)
    num_w = jax.random.normal(k2, (n_num, dim), jnp.float32)
    ln_w = jnp.ones((dim,), jnp.float32)
    ln_b = jnp.zeros((dim,), jnp.float32)

    # Inputs.
    xc = jax.random.randint(k3, (b, s, d_cls), 0, ncls, jnp.int32)
    xn = jax.random.normal(k4, (b, s, n_num), jnp.float32)

    out = feature_embedding(xc, xn, cls_tables, num_w, ln_w, ln_b)
    out = jax.block_until_ready(out)

    ref = _reference(xc, xn, cls_tables, num_w, ln_w, ln_b)
    assert out.shape == (b, s, d_cls + n_num, dim), out.shape
    assert jnp.allclose(out, ref, atol=1e-4, rtol=1e-4), "mismatch vs reference"

    print("KERNEL_OK")
</pallas_src>

<mosaic_0001>
module attributes {stable_mosaic.version = 11 : i64} {
  func.func @_feature_embedding_kernel(%arg0: i32, %arg1: memref<8x1xi32, #tpu.memory_space<vmem>>, %arg2: memref<8x3xf32, #tpu.memory_space<vmem>>, %arg3: memref<5x128xf32, #tpu.memory_space<vmem>>, %arg4: memref<128x128xf32, #tpu.memory_space<vmem>>, %arg5: memref<1x128xf32, #tpu.memory_space<vmem>>, %arg6: memref<1x128xf32, #tpu.memory_space<vmem>>, %arg7: memref<8x128xf32, #tpu.memory_space<vmem>>) attributes {dimension_semantics = [#tpu.dimension_semantics<parallel>], iteration_bounds = array<i64: 2>, scalar_prefetch = 0 : i64, scratch_operands = 0 : i64, tpu.core_type = #tpu.core_type<tc>, window_params = [{transform_indices = @transform_0, window_bounds = array<i64: 8, 1>}, {transform_indices = @transform_1, window_bounds = array<i64: 8, 3>}, {pipeline_mode = #tpu.pipeline_mode<synchronous>, transform_indices = @transform_2, window_bounds = array<i64: 5, 128>}, {pipeline_mode = #tpu.pipeline_mode<synchronous>, transform_indices = @transform_3, window_bounds = array<i64: 128, 128>}, {pipeline_mode = #tpu.pipeline_mode<synchronous>, transform_indices = @transform_4, window_bounds = array<i64: 1, 128>}, {pipeline_mode = #tpu.pipeline_mode<synchronous>, transform_indices = @transform_5, window_bounds = array<i64: 1, 128>}, {transform_indices = @transform_6, window_bounds = array<i64: 8, 128>}]} {
    %c0 = arith.constant 0 : index
    %c0_0 = arith.constant 0 : index
    %0 = vector.load %arg3[%c0, %c0_0] : memref<5x128xf32, #tpu.memory_space<vmem>>, vector<5x128xf32>
    %c0_1 = arith.constant 0 : index
    %c0_2 = arith.constant 0 : index
    %1 = vector.load %arg5[%c0_1, %c0_2] : memref<1x128xf32, #tpu.memory_space<vmem>>, vector<1x128xf32>
    %c0_3 = arith.constant 0 : index
    %c0_4 = arith.constant 0 : index
    %2 = vector.load %arg6[%c0_3, %c0_4] : memref<1x128xf32, #tpu.memory_space<vmem>>, vector<1x128xf32>
    %cst = arith.constant 0.000000e+00 : f32
    %3 = vector.broadcast %cst : f32 to vector<8x128xf32>
    %c0_5 = arith.constant 0 : index
    %c0_6 = arith.constant 0 : index
    %4 = vector.load %arg1[%c0_5, %c0_6] : memref<8x1xi32, #tpu.memory_space<vmem>>, vector<8x1xi32>
    %c0_i32 = arith.constant 0 : i32
    %5 = vector.broadcast %c0_i32 : i32 to vector<8x1xi32>
    %6 = arith.cmpi eq, %4, %5 : vector<8x1xi32>
    %7 = arith.extui %6 : vector<8x1xi1> to vector<8x1xi32>
    %8 = arith.sitofp %7 : vector<8x1xi32> to vector<8x1xf32>
    %9 = vector.extract_strided_slice %0 {offsets = [0, 0], sizes = [1, 128], strides = [1, 1]} : vector<5x128xf32> to vector<1x128xf32>
    %10 = vector.broadcast %8 : vector<8x1xf32> to vector<8x128xf32>
    %11 = vector.broadcast %9 : vector<1x128xf32> to vector<8x128xf32>
    %12 = arith.mulf %10, %11 : vector<8x128xf32>
    %13 = arith.addf %3, %12 : vector<8x128xf32>
    %c1_i32 = arith.constant 1 : i32
    %14 = vector.broadcast %c1_i32 : i32 to vector<8x1xi32>
    %15 = arith.cmpi eq, %4, %14 : vector<8x1xi32>
    %16 = arith.extui %15 : vector<8x1xi1> to vector<8x1xi32>
    %17 = arith.sitofp %16 : vector<8x1xi32> to vector<8x1xf32>
    %18 = vector.extract_strided_slice %0 {offsets = [1, 0], sizes = [1, 128], strides = [1, 1]} : vector<5x128xf32> to vector<1x128xf32>
    %19 = vector.broadcast %17 : vector<8x1xf32> to vector<8x128xf32>
    %20 = vector.broadcast %18 : vector<1x128xf32> to vector<8x128xf32>
    %21 = arith.mulf %19, %20 : vector<8x128xf32>
    %22 = arith.addf %13, %21 : vector<8x128xf32>
    %c0_7 = arith.constant 0 : index
    %c0_8 = arith.constant 0 : index
    %23 = vector.load %arg2[%c0_7, %c0_8] : memref<8x3xf32, #tpu.memory_space<vmem>>, vector<8x1xf32>
    %24 = vector.extract_strided_slice %0 {offsets = [2, 0], sizes = [1, 128], strides = [1, 1]} : vector<5x128xf32> to vector<1x128xf32>
    %25 = vector.broadcast %23 : vector<8x1xf32> to vector<8x128xf32>
    %26 = vector.broadcast %24 : vector<1x128xf32> to vector<8x128xf32>
    %27 = arith.mulf %25, %26 : vector<8x128xf32>
    %28 = arith.addf %22, %27 : vector<8x128xf32>
    %c0_9 = arith.constant 0 : index
    %c1 = arith.constant 1 : index
    %29 = vector.load %arg2[%c0_9, %c1] : memref<8x3xf32, #tpu.memory_space<vmem>>, vector<8x1xf32>
    %30 = vector.extract_strided_slice %0 {offsets = [3, 0], sizes = [1, 128], strides = [1, 1]} : vector<5x128xf32> to vector<1x128xf32>
    %31 = vector.broadcast %29 : vector<8x1xf32> to vector<8x128xf32>
    %32 = vector.broadcast %30 : vector<1x128xf32> to vector<8x128xf32>
    %33 = arith.mulf %31, %32 : vector<8x128xf32>
    %34 = arith.addf %28, %33 : vector<8x128xf32>
    %c0_10 = arith.constant 0 : index
    %c2 = arith.constant 2 : index
    %35 = vector.load %arg2[%c0_10, %c2] : memref<8x3xf32, #tpu.memory_space<vmem>>, vector<8x1xf32>
    %36 = vector.extract_strided_slice %0 {offsets = [4, 0], sizes = [1, 128], strides = [1, 1]} : vector<5x128xf32> to vector<1x128xf32>
    %37 = vector.broadcast %35 : vector<8x1xf32> to vector<8x128xf32>
    %38 = vector.broadcast %36 : vector<1x128xf32> to vector<8x128xf32>
    %39 = arith.mulf %37, %38 : vector<8x128xf32>
    %40 = arith.addf %34, %39 : vector<8x128xf32>
    %c0_11 = arith.constant 0 : index
    %c0_12 = arith.constant 0 : index
    %41 = vector.load %arg4[%c0_11, %c0_12] : memref<128x128xf32, #tpu.memory_space<vmem>>, vector<128x128xf32>
    %cst_13 = arith.constant dense<0.000000e+00> : vector<8x128xf32>
    %42 = tpu.matmul %40, %41, %cst_13 {dimension_numbers = #tpu.dot_dimension_numbers<[1], [0], [0], [1], [0, 0, 1, 1], [], []>} : vector<8x128xf32>, vector<128x128xf32>, vector<8x128xf32> -> vector<8x128xf32>
    %43 = arith.subf %40, %42 : vector<8x128xf32>
    %44 = arith.mulf %43, %43 : vector<8x128xf32>
    %c0_14 = arith.constant 0 : index
    %c0_15 = arith.constant 0 : index
    %45 = vector.load %arg4[%c0_14, %c0_15] : memref<128x128xf32, #tpu.memory_space<vmem>>, vector<128x128xf32>
    %cst_16 = arith.constant dense<0.000000e+00> : vector<8x128xf32>
    %46 = tpu.matmul %44, %45, %cst_16 {dimension_numbers = #tpu.dot_dimension_numbers<[1], [0], [0], [1], [0, 0, 1, 1], [], []>} : vector<8x128xf32>, vector<128x128xf32>, vector<8x128xf32> -> vector<8x128xf32>
    %cst_17 = arith.constant 9.99999996E-13 : f32
    %47 = vector.broadcast %cst_17 : f32 to vector<8x128xf32>
    %48 = arith.addf %46, %47 : vector<8x128xf32>
    %49 = math.rsqrt %48 : vector<8x128xf32>
    %50 = arith.mulf %43, %49 : vector<8x128xf32>
    %51 = vector.broadcast %1 : vector<1x128xf32> to vector<8x128xf32>
    %52 = arith.mulf %50, %51 : vector<8x128xf32>
    %53 = vector.broadcast %2 : vector<1x128xf32> to vector<8x128xf32>
    %54 = arith.addf %52, %53 : vector<8x128xf32>
    %c0_18 = arith.constant 0 : index
    %c0_19 = arith.constant 0 : index
    %55 = vector.load %arg7[%c0_18, %c0_19] : memref<8x128xf32, #tpu.memory_space<vmem>>, vector<8x128xf32>
    tpu.vector_store %arg7[%c0_18, %c0_19], %54 {strides = array<i32>} : memref<8x128xf32, #tpu.memory_space<vmem>>, vector<8x128xf32>,
    return
  }
  func.func @transform_0(%arg0: i32) -> (i32, i32) {
    %c0_i32 = arith.constant 0 : i32
    %c0_i32_0 = arith.constant 0 : i32
    return %arg0, %c0_i32 : i32, i32
  }
  func.func @transform_1(%arg0: i32) -> (i32, i32) {
    %c0_i32 = arith.constant 0 : i32
    %c0_i32_0 = arith.constant 0 : i32
    return %arg0, %c0_i32 : i32, i32
  }
  func.func @transform_2(%arg0: i32) -> (i32, i32) {
    %c0_i32 = arith.constant 0 : i32
    %c0_i32_0 = arith.constant 0 : i32
    %c0_i32_1 = arith.constant 0 : i32
    return %c0_i32, %c0_i32_0 : i32, i32
  }
  func.func @transform_3(%arg0: i32) -> (i32, i32) {
    %c0_i32 = arith.constant 0 : i32
    %c0_i32_0 = arith.constant 0 : i32
    %c0_i32_1 = arith.constant 0 : i32
    return %c0_i32, %c0_i32_0 : i32, i32
  }
  func.func @transform_4(%arg0: i32) -> (i32, i32) {
    %c0_i32 = arith.constant 0 : i32
    %c0_i32_0 = arith.constant 0 : i32
    %c0_i32_1 = arith.constant 0 : i32
    return %c0_i32, %c0_i32_0 : i32, i32
  }
  func.func @transform_5(%arg0: i32) -> (i32, i32) {
    %c0_i32 = arith.constant 0 : i32
    %c0_i32_0 = arith.constant 0 : i32
    %c0_i32_1 = arith.constant 0 : i32
    return %c0_i32, %c0_i32_0 : i32, i32
  }
  func.func @transform_6(%arg0: i32) -> (i32, i32) {
    %c0_i32 = arith.constant 0 : i32
    %c0_i32_0 = arith.constant 0 : i32
    return %arg0, %c0_i32 : i32, i32
  }
}

</mosaic_0001>

<bundles_post_ra>
// kernel: tpu_custom_call.1
= control target key start
LH: loop header
LB: loop body
LE: loop exit
PB: predicated region body
PF: predicated region fallthrough
CT: control target
= control target key end

     0   :  { %11 = vsyncpa [#allocation3], 0  ;;  %s838_s0 = inlined_call_operand.vmem [shape: s32[16,1], index: 0, kind: input, shape index: {}]   ;;  %s839_s1 = inlined_call_operand.vmem [shape: f32[16,3], index: 1, kind: input, shape index: {}]   ;;  %s840_s2 = inlined_call_operand.vmem [shape: f32[5,128], index: 2, kind: input, shape index: {}]   ;;  %s841_s3 = inlined_call_operand.hbm [shape: f32[128,128], index: 3, kind: input, shape index: {}]   ;;  %s842_s4 = inlined_call_operand.vmem [shape: f32[1,128], index: 4, kind: input, shape index: {}]   ;;  %s843_s5 = inlined_call_operand.vmem [shape: f32[1,128], index: 5, kind: input, shape index: {}]   ;;  %s844_s6 = inlined_call_operand.hbm [shape: f32[16,128], index: 6, kind: output, shape index: {}]  }
   0x1   :  { %12 = vsyncpa [#allocation4], 0 }
   0x2   :  { %14 = vsyncpa [#allocation4 + $0x1], 0  ;;  %s731_s21 = smov 0   ;;  %s733_s22 = smov 0  }
   0x3   :  { %s735_s23 = smov 0   ;;  %s737_s24 = smov 0  }
   0x4 LB: > { %s752_s25 = sadd.s32 4294967295, %s687_s24   ;;  %s507_s26 = sadd.s32 4294967294, %s687_s24   ;;  %s687_s24 = sphi %s737_s24, %s850_s24   ;;  %s683_s23 = sphi %s735_s23, %s849_s23   ;;  %s679_s22 = sphi %s733_s22, %s848_s22   ;;  %s675_s21 = sphi %s731_s21, %s847_s21  }
   0x5   : > { %s756_s27 = sadd.s32 1, %s687_s24   ;;  %s163_s28 = sadd.s32 1, %s683_s23 }
   0x6   : > { %s160_s29 = ssub.s32 %s687_s24, %s756_s27  ;;  %p173_p0 = scmp.ne.s32.totalorder %s683_s23, %s679_s22 }
   0x7   : > { %p161_p1 = scmp.eq.s32.totalorder %s160_s29, 0  ;;  %p174_p2 = scmp.eq.s32.totalorder %s752_s25, 1 }
   0x8   : > { %p179_p3 = scmp.ne.s32.totalorder %s679_s22, %s675_s21  ;;  %p180_p4 = scmp.eq.s32.totalorder %s507_s26, 1 }
   0x9   : > { %s767_s30 = scalar_select %p161_p1, %s683_s23, %s163_s28  }
   0xa   : > { %p769_p5 = por %p174_p2, %p173_p0  ;;  %p773_p6 = por %p180_p4, %p179_p3 }
   0xb   : > { %p508_p7 = scmp.ge.s32.totalorder %s687_s24, 1  ;;  %p187_p8 = scmp.lt.s32.totalorder %s687_s24, 3 }
   0xc   : > { %p536_p9 = scmp.eq.s32.totalorder %s752_s25, 0  ;;  %s201_s11 = sshll.u32 %s841_s3, 4  ;;  %s202_s11 = int_to_ptr.hbm [resolvable:$true] %s201_s11 }
   0xd   : > { %p188_p10 = pnand %p508_p7, %p187_p8  ;;  %s689_s12 = smov [#allocation2]  }
   0xe   : > { %s203_s13 = sshll.u32 %s689_s12, 4  ;;  %s690_s14 = smov 128   ;;  %s204_s13 = int_to_ptr.vmem [resolvable:$true] %s203_s13 }
   0xf   : > { %p528_p11 = pneg %p188_p10  ;;  %s691_s15 = smov 8  }
  0x10   : > { %239 = sbr.rel (%p188_p10) target bundleno = 449 (0x1c1), region = 44 }
  0x11   : > { %p529_p12 = pnand %p536_p9, %p528_p11 }
  0x13   : > { %531 = dma.hbm_to_vmem [thread:$0]  (!%p529_p12), %s202_s11, 2048, %s204_s13, [#allocation3], %s690_s14, %s690_s14, %s691_s15  }
  0x15   : > { %666 = dma.done.wait (%p536_p9), [#allocation3], 2048  }
  0x16   : > { %668 = vsyncadd (%p536_p9), [#allocation3], 4294965248  ;;  %p273_p13 = scmp.lt.s32.totalorder %s752_s25, 1  ;;  %v692_v0 = vmov 0   ;;  %v693_v1 = vmov 1   ;;  %v345_v4 = vld [vmem:[#allocation2 + $0x78] sm:$0xff] }
  0x17   : > { %578 = vset.pattern.permute.xlu0 %v692_v0  ;;  %584 = vset.pattern.permute.xlu1 %v693_v1  ;;  %v344_v5 = vld [vmem:[#allocation2 + $0x70] sm:$0xff]  ;;  %v694_v6 = vmov 0.0   ;;  %v343_v9 = vld [vmem:[#allocation2 + $0x68] sm:$0xff]  ;;  %v342_v11 = vld [vmem:[#allocation2 + $0x60] sm:$0xff]  ;;  %v695_v14 = vmov 2   ;;  %s270_s11 = sand.u32 1, %s679_s22  }
  0x18   : > { %s274_s16 = scalar_select %p273_p13, %s752_s25, 1  ;;  %346 = vmatpush.msra.mxu0 %v345_v4  ;;  %368 = vmatpush.msra.mxu1 %v345_v4  ;;  %v341_v12 = vld [vmem:[#allocation2 + $0x58] sm:$0xff]  ;;  %v340_v13 = vld [vmem:[#allocation2 + $0x50] sm:$0xff]  ;;  %v339_v15 = vld [vmem:[#allocation2 + $0x48] sm:$0xff] }
  0x19   : > { %v338_v16 = vld [vmem:[#allocation2 + $0x40] sm:$0xff]  ;;  %v337_v17 = vld [vmem:[#allocation2 + $0x38] sm:$0xff]  ;;  %v336_v18 = vld [vmem:[#allocation2 + $0x30] sm:$0xff]  ;;  %s513_s12 = sshll.u32 %s270_s11, 3  ;;  %s519_s13 = sshll.u32 %s752_s25, 3 }
  0x1a   : > { %s514_s17 = sshll.u32 %s274_s16, 3  ;;  %347 = vmatpush.msra.mxu0 %v344_v5  ;;  %369 = vmatpush.msra.mxu1 %v344_v5  ;;  %v335_v19 = vld [vmem:[#allocation2 + $0x28] sm:$0xff]  ;;  %v334_v20 = vld [vmem:[#allocation2 + $0x20] sm:$0xff]  ;;  %v333_v21 = vld [vmem:[#allocation2 + $0x18] sm:$0xff]  ;;  %s419_s18 = scalar_lea.hbm %s844_s6, %s519_s13 }
  0x1b   : > { %s276_s20 = scalar_lea.vmem %s838_s0, %s514_s17  ;;  %s280_s29 = scalar_lea.vmem %s839_s1, %s514_s17  ;;  %v332_v22 = vld [vmem:[#allocation2 + $0x10] sm:$0xff]  ;;  %v331_v23 = vld [vmem:[#allocation2 + $0x8] sm:$0xff]  ;;  %v330_v24 = vld [vmem:[#allocation2] sm:$0xff] }
  0x1c   : > { %v284_v2 = vld [vmem:[%s276_s20] sm:$0xff]  ;;  %348 = vmatpush.msra.mxu0 %v343_v9  ;;  %370 = vmatpush.msra.mxu1 %v343_v9  ;;  %s272_s26 = scalar_lea.vmem [#allocation5], %s513_s12  ;;  %s423_s28 = sshll.u32 %s419_s18, 4  ;;  %s424_s28 = int_to_ptr.hbm [resolvable:$true] %s423_s28 }
  0x1d   : > { %v307_v3 = vld [vmem:[%s280_s29] sm:$0xff]  ;;  %vm285_vm0 = vcmp.eq.s32.totalorder %v284_v2, 0  ;;  %vm296_vm1 = vcmp.eq.s32.totalorder %v284_v2, 1  ;;  %s421_s25 = sshll.u32 %s272_s26, 4  ;;  %s409_s29 = scalar_lea.sflag [#allocation4], %s270_s11  ;;  %s422_s25 = int_to_ptr.vmem [resolvable:$true] %s421_s25 }
  0x1e   : > { %317 = vperm.xlu1 %584, %v307_v3   ;;  %v516_v7 = vsel %vm285_vm0, 1.0, %v694_v6  ;;  %v517_v8 = vsel %vm296_vm1, 1.0, %v694_v6  ;;  %349 = vmatpush.msra.mxu0 %v342_v11  ;;  %v281_v25 = vld [vmem:[%s840_s2] sm:$0x1f]  ;;  %s635_s9 = sshra.s32 %s424_s28, 4  ;;  %s641_s15 = scalar_lea.hbm %s844_s6, 16  ;;  %s636_s9 = int_to_ptr.hbm [resolvable:$true] %s635_s9 }
  0x1f   : > { %v579_v10 = vpack.i.bf16 %v517_v8, %v516_v7  ;;  %371 = vmatpush.msra.mxu1 %v342_v11  ;;  %v293_v30 = vperm.slane %v281_v25, 0  ;;  %v304_v31 = vperm.slane %v281_v25, 1  ;;  %v313_v34 = vperm.slane %v281_v25, 2  ;;  %v587_v57 = vld [vmem:[%s842_s4] ss:$0 sm:$0xff]  ;;  %s637_s10 = scalar_lea.hbm %s636_s9, 8  ;;  %p642_p3 = scmp.lt.s32.totalorder %s636_s9, %s844_s6 }
  0x20   : > { %350 = vmatpush.msra.mxu0 %v341_v12  ;;  %v320_v35 = vperm.slane %v281_v25, 3  ;;  %v327_v36 = vperm.slane %v281_v25, 4  ;;  %v588_v60 = vld [vmem:[%s843_s5] ss:$0 sm:$0xff]  ;;  %p638_p0 = scmp.ne.s32.totalorder %s636_s9, %s637_s10  ;;  %p643_p4 = scmp.lt.s32.totalorder %s641_s15, %s637_s10 }
  0x21   : > { %580 = vperm.xlu0 %578, %v579_v10   ;;  %372 = vmatpush.msra.mxu1 %v341_v12 }
  0x22   : > { %351 = vmatpush.msra.mxu0 %v340_v13  ;;  %p639_p1 = pnand %p638_p0, %p769_p5  ;;  %p644_p7 = por %p643_p4, %p642_p3 }
  0x23   : > { %373 = vmatpush.msra.mxu1 %v340_v13 }
  0x24   : > { %352 = vmatpush.msra.mxu0 %v339_v15  ;;  %p640_p2 = pneg %p639_p1 }
  0x25   : > { %374 = vmatpush.msra.mxu1 %v339_v15 }
  0x26   : > { %585 = vset.pattern.permute.xlu1 %v695_v14  ;;  %353 = vmatpush.msra.mxu0 %v338_v16  ;;  %p645_p8 = pnand %p644_p7, %p640_p2 }
  0x27   : > { %324 = vperm.xlu1 %585, %v307_v3   ;;  %375 = vmatpush.msra.mxu1 %v338_v16 }
  0x28   : > { %354 = vmatpush.msra.mxu0 %v337_v17 }
  0x29   : > { %310 = vperm.xlu0 %578, %v307_v3   ;;  %376 = vmatpush.msra.mxu1 %v337_v17 }
  0x2a   : > { %355 = vmatpush.msra.mxu0 %v336_v18 }
  0x2b   : > { %377 = vmatpush.msra.mxu1 %v336_v18 }
  0x2c   : > { %356 = vmatpush.msra.mxu0 %v335_v19 }
  0x2d   : > { %378 = vmatpush.msra.mxu1 %v335_v19 }
  0x2e   : > { %357 = vmatpush.msra.mxu0 %v334_v20 }
  0x2f   : > { %379 = vmatpush.msra.mxu1 %v334_v20 }
  0x30   : > { %358 = vmatpush.msra.mxu0 %v333_v21 }
  0x31   : > { %586 = vset.pattern.permute.xlu0 %v695_v14  ;;  %380 = vmatpush.msra.mxu1 %v333_v21 }
  0x32   : > { %359 = vmatpush.msra.mxu0 %v332_v22 }
  0x33   : > { %381 = vmatpush.msra.mxu1 %v332_v22 }
  0x34   : > { %360 = vmatpush.msra.mxu0 %v331_v23 }
  0x35   : > { %382 = vmatpush.msra.mxu1 %v331_v23 }
  0x36   : > { %361 = vmatpush.msra.mxu0 %v330_v24 }
  0x37   : > { %383 = vmatpush.msra.mxu1 %v330_v24 }
  0x90   : > { %v318_v26 = vpop.permute.xlu1 %317 }
  0x91   : > { %v321_v41 = vmul.f32 %v320_v35, %v318_v26 }
  0x93   : > { %v581_v27 = vpop.permute.xlu0 %580 }
  0x94   : > { %v583_v28 = vunpack.i.h.bf16 %v581_v27  ;;  %v582_v29 = vunpack.i.l.bf16 %v581_v27 }
  0x96   : > { %v294_v32 = vmul.f32 %v582_v29, %v293_v30  ;;  %v305_v33 = vmul.f32 %v583_v28, %v304_v31 }
  0x98   : > { %v306_v39 = vadd.f32 %v305_v33, %v294_v32 }
  0x99   : > { %v325_v38 = vpop.permute.xlu1 %324 }
  0x9a   : > { %v328_v43 = vmul.f32 %v327_v36, %v325_v38 }
  0x9b   : > { %v311_v37 = vpop.permute.xlu0 %310 }
  0x9c   : > { %v314_v40 = vmul.f32 %v313_v34, %v311_v37 }
  0x9e   : > { %v315_v42 = vadd.f32 %v314_v40, %v306_v39 }
  0xa0   : > { %v322_v44 = vadd.f32 %v321_v41, %v315_v42 }
  0xa2   : > { %v329_v45 = vadd.f32 %v328_v43, %v322_v44 }
  0xa4   : > { %362 = vmatmul.f32.vlgmr.msra.gmra.mxu0 %v329_v45 }
 0x121   : > { %v363_v46 = vpop.f32.mrf.mxu0 }
 0x122   : > { %v366_v47 = vsub.f32 %v329_v45, %v363_v46 }
 0x124   : > { %v367_v48 = vmul.f32 %v366_v47, %v366_v47 }
 0x126   : > { %384 = vmatmul.f32.vlgmr.msra.gmra.mxu1 %v367_v48 }
 0x1a3   : > { %v385_v49 = vpop.f32.mrf.mxu1 }
 0x1a4   : > { %v386_v50 = vadd.f32 1e-12, %v385_v49 }
 0x1a6   : > { %589 = vrsqrt.f32 %v386_v50  ;;  %vm394_vm3 = vweird.f32 %v386_v50 }
 0x1ac   : > { %v590_v51 = vpop.eup %589 }
 0x1ad   : > { %v389_v52 = vmul.f32 %v590_v51, %v386_v50  ;;  %vm395_vm2 = vweird.f32 %v590_v51 }
 0x1ae   : > { %vm396_vm4 = vmor %vm394_vm3, %vm395_vm2 }
 0x1af   : > { %v390_v53 = vmul.f32 %v590_v51, %v389_v52 }
 0x1b1   : > { %v391_v54 = vmul.f32 0.5, %v390_v53 }
 0x1b3   : > { %v392_v55 = vsub.f32 1.5, %v391_v54 }
 0x1b5   : > { %v393_v56 = vmul.f32 %v590_v51, %v392_v55 }
 0x1b7   : > { %v397_v58 = vsel %vm396_vm4, %v590_v51, %v393_v56 }
 0x1b8   : > { %v398_v59 = vmul.f32 %v397_v58, %v366_v47 }
 0x1ba   : > { %v402_v61 = vmul.f32 %v587_v57, %v398_v59 }
 0x1bc   : > { %v406_v62 = vadd.f32 %v588_v60, %v402_v61 }
 0x1be   : > { %407 = vst [vmem:[%s272_s26] sm:$0xff] %v406_v62 }
 0x1bf   : > { %648 = shalt.err (!%p645_p8)
}
 0x1c0   : > { %526 = dma.vmem_to_hbm [thread:$0]  (%p769_p5), %s422_s25, 128, %s424_s28, %s409_s29  }
 0x1c1 PF: > { %p538_p9 = scmp.ge.s32.totalorder %s687_s24, 2  ;;  %s435_s11 = sand.u32 1, %s675_s21  }
 0x1c2   : > { %s436_s17 = scalar_lea.sflag [#allocation4], %s435_s11 }
 0x1c3   : > { %p533_p10 = pnand %p538_p9, %p773_p6 }
 0x1c5   : > { %p534_p11 = pneg %p533_p10 }
 0x1c7   : > { %670 = dma.done.wait (%p534_p11), %s436_s17, 128  }
 0x1c8   : > { %672 = vsyncadd (%p534_p11), %s436_s17, 4294967168  ;;  %p17_p12 = scmp.ge.s32.totalorder %s756_s27, 4   ;;  %s847_s21 = smov %s679_s22 }
 0x1c9   : > { %s848_s22 = smov %s683_s23  ;;  %s849_s23 = smov %s767_s30 }
 0x1ca   : > { %s850_s24 = smov %s756_s27  ;;  %19 = sbr.rel (!%p17_p12) target bundleno = 4 (0x4), region = 87 }
 0x1cf   :  { %442 = vsyncpa [#allocation3], 1 }
 0x1d0   :  { %444 = vsyncpa [#allocation3 + $0x1], 1 }
 0x1d1   :  { %445 = vsyncpa [#allocation4], 1 }
 0x1d2   :  { %447 = vsyncpa [#allocation4 + $0x1], 1 }

</bundles_post_ra>
